<compile_context>
chip_gen: v5e
topology: v5e:2x2
jax: 0.10.0
libtpu: 0.0.40
codegen_flags: <defaults>
</compile_context>

<pallas_src>
import jax
import jax.numpy as jnp
from jax.experimental import pallas as pl
from jax.experimental.pallas import tpu as pltpu


def neurofis_kernel(p_ref, x_ref, o_ref):
    # p_ref: [32, 8] packed params (cols 0:4 = W1, 4 = b1, 5 = W2, 6 = b2)
    # x_ref: [4, TILE_B]   (features on sublanes, batch on lanes)
    # o_ref: [1, TILE_B]   (lane-dense output tile)
    p = p_ref[...]
    x = x_ref[...]

    w1 = p[:, 0:4]      # [32, 4]
    b1 = p[:, 4:5]      # [32, 1]
    w2 = p[:, 5:6]      # [32, 1]
    b2 = p[0:1, 6:7]    # [1, 1]

    # Layer 1 on the MXU (K=4, M=32): frees the VALU slots that dominated the
    # unrolled broadcast-FMA version. f32 accumulate, highest precision.
    h = jnp.dot(w1, x,
                preferred_element_type=jnp.float32,
                precision=jax.lax.Precision.HIGHEST)     # [32, TILE_B]
    h = jnp.maximum(h + b1, 0.0)                          # bias + ReLU (VPU)

    # Layer 2: weighted reduction. Fold 32 -> 8 sublanes with plain VPU adds,
    # then a single 8 -> 1 cross-sublane reduce on the XLU.
    t = w2 * h                                            # [32, TILE_B]
    t8 = t[0:8, :] + t[8:16, :] + t[16:24, :] + t[24:32, :]   # [8, TILE_B]
    y = jnp.sum(t8, axis=0, keepdims=True) + b2           # [1, TILE_B]
    o_ref[...] = y.astype(o_ref.dtype)


def _pick_tile_b(batch, max_tile_b):
    # Aim for at least 2 grid steps (keeps both v7x TensorCores busy) while
    # keeping tiles big enough to amortize per-step overhead, capped so
    # double-buffered tiles + [32, tile_b] f32 intermediates fit VMEM on v7x.
    t = -(-batch // 2)                     # ceil(B / 2)
    t = ((t + 127) // 128) * 128           # multiple of 128 (lane-dense)
    return max(128, min(t, max_tile_b))


def neurofis_forward(x, w1, b1, w2, b2, *, tile_b=None, max_tile_b=32768):
    """Forward pass of NeuroFIS.

    x : [B, 4] float32
    w1: [32, 4] (PyTorch Linear(4,32).weight layout)
    b1: [32]
    w2: [32]    (PyTorch Linear(32,1).weight flattened)
    b2: scalar
    returns [B, 1] float32
    """
    B = x.shape[0]
    if tile_b is None:
        tile_b = _pick_tile_b(B, max_tile_b)
    assert tile_b % 128 == 0, "tile_b must be a multiple of 128 (lane-dense)"
    nb = pl.cdiv(B, tile_b)
    b_pad = nb * tile_b

    # Batch on the lane axis; pad only the ragged tail.
    x_t = x.T.astype(jnp.float32)                      # [4, B]
    if b_pad != B:
        x_t = jnp.pad(x_t, ((0, 0), (0, b_pad - B)))   # [4, b_pad]

    # Pack every parameter into a single small VMEM-resident operand.
    params = jnp.concatenate(
        [
            w1.astype(jnp.float32),                              # cols 0:4
            b1.reshape(32, 1).astype(jnp.float32),               # col 4
            w2.reshape(32, 1).astype(jnp.float32),               # col 5
            jnp.full((32, 1), b2, jnp.float32),                  # col 6 (b2)
            jnp.zeros((32, 1), jnp.float32),                     # col 7 (pad)
        ],
        axis=1,
    )  # [32, 8]

    out_t = pl.pallas_call(
        neurofis_kernel,
        out_shape=jax.ShapeDtypeStruct((1, b_pad), jnp.float32),
        grid=(nb,),
        in_specs=[
            pl.BlockSpec((32, 8), lambda i: (0, 0)),        # params stay resident
            pl.BlockSpec((4, tile_b), lambda i: (0, i)),    # x tile (lane-dense)
        ],
        out_specs=pl.BlockSpec((1, tile_b), lambda i: (0, i)),
        compiler_params=pltpu.CompilerParams(
            dimension_semantics=("parallel",),
            vmem_limit_bytes=48 * 1024 * 1024,   # explicit budget; < 64 MiB (v7x)
        ),
    )(params, x_t)

    return out_t[0, :B].reshape(B, 1)


def init_params(key):
    # Deterministic init mimicking nn.Linear default: U(-1/sqrt(fan_in), +).
    k1, k2, k3, k4 = jax.random.split(key, 4)
    bound1 = 1.0 / jnp.sqrt(4.0)
    bound2 = 1.0 / jnp.sqrt(32.0)
    w1 = jax.random.uniform(k1, (32, 4), jnp.float32, -bound1, bound1)
    b1 = jax.random.uniform(k2, (32,), jnp.float32, -bound1, bound1)
    w2 = jax.random.uniform(k3, (32,), jnp.float32, -bound2, bound2)
    b2 = jax.random.uniform(k4, (), jnp.float32, -bound2, bound2)
    return w1, b1, w2, b2


def _reference(x, w1, b1, w2, b2):
    return jnp.maximum(x @ w1.T + b1, 0.0) @ w2.reshape(32, 1) + b2


if __name__ == "__main__":
    key = jax.random.PRNGKey(0)
    kx, kp = jax.random.split(key)
    w1, b1, w2, b2 = init_params(kp)

    # Small shape consistent with the module (batch of 4-feature rows).
    B = 8
    x = jax.random.normal(kx, (B, 4), jnp.float32)

    out = neurofis_forward(x, w1, b1, w2, b2)
    jax.block_until_ready(out)

    ref = _reference(x, w1, b1, w2, b2)
    assert out.shape == (B, 1)
    assert jnp.allclose(out, ref, atol=1e-4, rtol=1e-4), "mismatch vs reference"

    # Extra check: multi-step grid + ragged tail (B not a multiple of tile_b).
    B2 = 300
    x2 = jax.random.normal(jax.random.PRNGKey(1), (B2, 4), jnp.float32)
    out2 = neurofis_forward(x2, w1, b1, w2, b2, tile_b=128)
    jax.block_until_ready(out2)
    ref2 = _reference(x2, w1, b1, w2, b2)
    assert out2.shape == (B2, 1)
    assert jnp.allclose(out2, ref2, atol=1e-4, rtol=1e-4), "tail mismatch"

    # Extra check: auto-tiled path with >= 2 grid steps.
    B3 = 1030
    x3 = jax.random.normal(jax.random.PRNGKey(2), (B3, 4), jnp.float32)
    out3 = neurofis_forward(x3, w1, b1, w2, b2)
    jax.block_until_ready(out3)
    ref3 = _reference(x3, w1, b1, w2, b2)
    assert out3.shape == (B3, 1)
    assert jnp.allclose(out3, ref3, atol=1e-4, rtol=1e-4), "auto-tile mismatch"

    print("KERNEL_OK")
</pallas_src>

<mosaic_0001>
module attributes {stable_mosaic.version = 11 : i64} {
  func.func @neurofis_kernel(%arg0: i32, %arg1: memref<32x8xf32, #tpu.memory_space<vmem>>, %arg2: memref<4x128xf32, #tpu.memory_space<vmem>>, %arg3: memref<1x128xf32, #tpu.memory_space<vmem>>) attributes {dimension_semantics = [#tpu.dimension_semantics<parallel>], iteration_bounds = array<i64: 1>, scalar_prefetch = 0 : i64, scratch_operands = 0 : i64, tpu.core_type = #tpu.core_type<tc>, window_params = [{pipeline_mode = #tpu.pipeline_mode<synchronous>, transform_indices = @transform_0, window_bounds = array<i64: 32, 8>}, {transform_indices = @transform_1, window_bounds = array<i64: 4, 128>}, {transform_indices = @transform_2, window_bounds = array<i64: 1, 128>}]} {
    %c0 = arith.constant 0 : index
    %c0_0 = arith.constant 0 : index
    %0 = vector.load %arg1[%c0, %c0_0] : memref<32x8xf32, #tpu.memory_space<vmem>>, vector<32x8xf32>
    %c0_1 = arith.constant 0 : index
    %c0_2 = arith.constant 0 : index
    %1 = vector.load %arg2[%c0_1, %c0_2] : memref<4x128xf32, #tpu.memory_space<vmem>>, vector<4x128xf32>
    %2 = vector.extract_strided_slice %0 {offsets = [0, 0], sizes = [32, 4], strides = [1, 1]} : vector<32x8xf32> to vector<32x4xf32>
    %3 = vector.extract_strided_slice %0 {offsets = [0, 4], sizes = [32, 1], strides = [1, 1]} : vector<32x8xf32> to vector<32x1xf32>
    %4 = vector.extract_strided_slice %0 {offsets = [0, 5], sizes = [32, 1], strides = [1, 1]} : vector<32x8xf32> to vector<32x1xf32>
    %5 = vector.extract_strided_slice %0 {offsets = [0, 6], sizes = [1, 1], strides = [1, 1]} : vector<32x8xf32> to vector<1x1xf32>
    %cst = arith.constant dense<0.000000e+00> : vector<32x128xf32>
    %6 = tpu.matmul %2, %1, %cst {dimension_numbers = #tpu.dot_dimension_numbers<[1], [0], [0], [1], [0, 0, 1, 1], [], []>, precision = #tpu.contract_precision<fp32>} : vector<32x4xf32>, vector<4x128xf32>, vector<32x128xf32> -> vector<32x128xf32>
    %7 = vector.broadcast %3 : vector<32x1xf32> to vector<32x128xf32>
    %8 = arith.addf %6, %7 : vector<32x128xf32>
    %cst_3 = arith.constant 0.000000e+00 : f32
    %9 = vector.broadcast %cst_3 : f32 to vector<32x128xf32>
    %10 = arith.maximumf %8, %9 : vector<32x128xf32>
    %11 = vector.broadcast %4 : vector<32x1xf32> to vector<32x128xf32>
    %12 = arith.mulf %11, %10 : vector<32x128xf32>
    %13 = vector.extract_strided_slice %12 {offsets = [0, 0], sizes = [8, 128], strides = [1, 1]} : vector<32x128xf32> to vector<8x128xf32>
    %14 = vector.extract_strided_slice %12 {offsets = [8, 0], sizes = [8, 128], strides = [1, 1]} : vector<32x128xf32> to vector<8x128xf32>
    %15 = arith.addf %13, %14 : vector<8x128xf32>
    %16 = vector.extract_strided_slice %12 {offsets = [16, 0], sizes = [8, 128], strides = [1, 1]} : vector<32x128xf32> to vector<8x128xf32>
    %17 = arith.addf %15, %16 : vector<8x128xf32>
    %18 = vector.extract_strided_slice %12 {offsets = [24, 0], sizes = [8, 128], strides = [1, 1]} : vector<32x128xf32> to vector<8x128xf32>
    %19 = arith.addf %17, %18 : vector<8x128xf32>
    %cst_4 = arith.constant dense<0.000000e+00> : vector<128xf32>
    %20 = vector.multi_reduction <add>, %19, %cst_4 [0] : vector<8x128xf32> to vector<128xf32>
    %21 = vector.shape_cast %20 : vector<128xf32> to vector<1x128xf32>
    %22 = vector.broadcast %5 : vector<1x1xf32> to vector<1x128xf32>
    %23 = arith.addf %21, %22 : vector<1x128xf32>
    %c0_5 = arith.constant 0 : index
    %c0_6 = arith.constant 0 : index
    %24 = vector.load %arg3[%c0_5, %c0_6] : memref<1x128xf32, #tpu.memory_space<vmem>>, vector<1x128xf32>
    tpu.vector_store %arg3[%c0_5, %c0_6], %23 {strides = array<i32>} : memref<1x128xf32, #tpu.memory_space<vmem>>, vector<1x128xf32>,
    return
  }
  func.func @transform_0(%arg0: i32) -> (i32, i32) {
    %c0_i32 = arith.constant 0 : i32
    %c0_i32_0 = arith.constant 0 : i32
    %c0_i32_1 = arith.constant 0 : i32
    return %c0_i32, %c0_i32_0 : i32, i32
  }
  func.func @transform_1(%arg0: i32) -> (i32, i32) {
    %c0_i32 = arith.constant 0 : i32
    %c0_i32_0 = arith.constant 0 : i32
    return %c0_i32, %arg0 : i32, i32
  }
  func.func @transform_2(%arg0: i32) -> (i32, i32) {
    %c0_i32 = arith.constant 0 : i32
    %c0_i32_0 = arith.constant 0 : i32
    return %c0_i32, %arg0 : i32, i32
  }
}

</mosaic_0001>

<bundles_post_ra>
// kernel: tpu_custom_call.1
= control target key start
LH: loop header
LB: loop body
LE: loop exit
PB: predicated region body
PF: predicated region fallthrough
CT: control target
= control target key end

     0   :  { %vm46_vm0 = vcmask 1043456   ;;  %vm37_vm1 = vcmask 31744   ;;  %v383_v12 = vmov 4   ;;  %s447_s0 = inlined_call_operand.vmem [shape: f32[32,8], index: 0, kind: input, shape index: {}]   ;;  %s448_s1 = inlined_call_operand.vmem [shape: f32[4,128], index: 1, kind: input, shape index: {}]   ;;  %s449_s2 = inlined_call_operand.hbm [shape: f32[1,128], index: 2, kind: output, shape index: {}]  }
   0x1   :  { %v16_v0 = vld [vmem:[%s448_s1] sm:$0xf]  ;;  %v14_v1 = vld [vmem:[%s447_s0 + $0x10] sm:$0xff]  ;;  %v15_v2 = vld [vmem:[%s447_s0 + $0x18] sm:$0xff]  ;;  %351 = vset.pattern.permute.xlu1 %v383_v12  ;;  %350 = vset.pattern.permute.xlu0 %v383_v12 }
   0x2   :  { %v48_v3 = vsel %vm46_vm0, %v16_v0, 0  ;;  %v42_v4 = vsel %vm37_vm1, %v14_v1, 0  ;;  %v44_v5 = vsel %vm37_vm1, %v15_v2, 0  ;;  %v416_v6 = vld [vmem:[%s447_s0] sm:$0xff]  ;;  %v421_v7 = vld [vmem:[%s447_s0 + $0x8] sm:$0xff] }
   0x3   :  { %v65_v8 = vand.u32 4294901760, %v48_v3  ;;  %v423_v9 = vand.u32 4294901760, %v42_v4  ;;  %v425_v10 = vand.u32 4294901760, %v44_v5  ;;  %v38_v11 = vsel %vm37_vm1, %v416_v6, 0 }
   0x4   :  { %7 = vsyncpa [#allocation3], 0  ;;  %v67_v13 = vand.u32 4294901760, %v38_v11  ;;  %29 = vperm.xlu1 %351, %v14_v1   ;;  %v40_v14 = vsel %vm37_vm1, %v421_v7, 0  ;;  %19 = vperm.xlu0 %350, %v416_v6   ;;  %v384_v36 = vmov 5   ;;  %v385_v37 = vmov 6  }
   0x5   :  { %344 = vmatpush.msra.mxu2 %v65_v8  ;;  %v84_v15 = vsub.f32 %v42_v4, %v423_v9  ;;  %v116_v16 = vsub.f32 %v48_v3, %v65_v8  ;;  %v92_v17 = vsub.f32 %v44_v5, %v425_v10  ;;  %66 = vmatpush.msra.mxu0 %v65_v8  ;;  %v75_v18 = vand.u32 4294901760, %v40_v14  ;;  %s386_s0 = smov [#allocation2]   ;;  %s335_s21 = sshll.u32 %s449_s2, 4  ;;  %s336_s21 = int_to_ptr.hbm [resolvable:$true] %s335_s21 }
   0x6   :  { %v68_v19 = vsub.f32 %v38_v11, %v67_v13  ;;  %352 = vset.pattern.permute.xlu2 %v384_v36  ;;  %s333_s18 = sshll.u32 %s386_s0, 4  ;;  %s334_s18 = int_to_ptr.vmem [resolvable:$true] %s333_s18 }
   0x7   :  { %v85_v20 = vand.u32 4294901760, %v84_v15  ;;  %155 = vmatpush.msrb.mxu2 %v116_v16  ;;  %v117_v21 = vand.u32 4294901760, %v116_v16  ;;  %v76_v22 = vsub.f32 %v40_v14, %v75_v18  ;;  %v93_v26 = vand.u32 4294901760, %v92_v17  ;;  %294 = vperm.xlu2 %352, %v416_v6  }
   0x8   :  { %v69_v23 = vand.u32 4294901760, %v68_v19 }
   0x9   :  { %v86_v24 = vsub.f32 %v84_v15, %v85_v20  ;;  %v118_v25 = vsub.f32 %v116_v16, %v117_v21  ;;  %237 = vmatpush.msrb.mxu0 %v117_v21  ;;  %v77_v28 = vand.u32 4294901760, %v76_v22  ;;  %v94_v32 = vsub.f32 %v92_v17, %v93_v26 }
   0xa   :  { %v70_v27 = vsub.f32 %v68_v19, %v69_v23 }
   0xb   :  { %v87_v29 = vand.u32 4294901760, %v86_v24  ;;  %v119_v30 = vand.u32 4294901760, %v118_v25  ;;  %v78_v33 = vsub.f32 %v76_v22, %v77_v28  ;;  %v95_v34 = vand.u32 4294901760, %v94_v32 }
   0xc   :  { %v71_v31 = vand.u32 4294901760, %v70_v27  ;;  %34 = vperm.xlu1 %351, %v15_v2   ;;  %24 = vperm.xlu0 %350, %v421_v7  }
   0xd   :  { %88 = vmatmul.f32.vlgmr.msra.gmra.mxu2 %v87_v29  ;;  %345 = vmatpush.msra.mxu3 %v119_v30  ;;  %v79_v35 = vand.u32 4294901760, %v78_v33 }
   0xe   :  { %130 = vmatmul.f32.vlgmr.msra.gmra.mxu3 %v423_v9  ;;  %72 = vmatmul.f32.vlgmr.msra.gmra.mxu0 %v71_v31 }
   0xf   :  { %193 = vmatpush.msrb.mxu3 %v65_v8  ;;  %120 = vmatpush.msra.mxu1 %v119_v30 }
  0x10   :  { %122 = vmatmul.f32.vlgmr.msra.gmra.mxu1 %v67_v13  ;;  %298 = vperm.xlu2 %352, %v421_v7  }
  0x11   :  { %271 = vmatpush.msrb.mxu1 %v65_v8 }
  0x14   :  { %353 = vset.pattern.permute.xlu0 %v384_v36  ;;  %354 = vset.pattern.permute.xlu1 %v384_v36 }
  0x15   :  { %96 = vmatmul.f32.gmra.mxu2 %v95_v34  ;;  %302 = vperm.xlu0 %353, %v14_v1  }
  0x16   :  { %134 = vmatmul.f32.gmra.mxu3 %v425_v10  ;;  %80 = vmatmul.f32.gmra.mxu0 %v79_v35 }
  0x17   :  { %306 = vperm.xlu1 %354, %v15_v2  }
  0x18   :  { %126 = vmatmul.f32.gmra.mxu1 %v75_v18  ;;  %355 = vset.pattern.permute.xlu2 %v385_v37 }
  0x19   :  { %323 = vperm.xlu2 %355, %v416_v6  }
  0x1d   :  { %158 = vmatmul.f32.vlgmr.msrb.gmra.mxu2 %v68_v19  ;;  %356 = vset.pattern.permute.xlu0 %v385_v37 }
  0x1e   :  { %197 = vmatmul.f32.vlgmr.msrb.gmra.mxu3 %v69_v23  ;;  %239 = vmatmul.f32.vlgmr.msrb.gmra.mxu0 %v67_v13 }
  0x20   :  { %273 = vmatmul.f32.vlgmr.msrb.gmra.mxu1 %v67_v13 }
  0x25   :  { %163 = vmatmul.f32.gmra.mxu2 %v76_v22 }
  0x26   :  { %203 = vmatmul.f32.gmra.mxu3 %v77_v28  ;;  %243 = vmatmul.f32.gmra.mxu0 %v75_v18 }
  0x28   :  { %277 = vmatmul.f32.gmra.mxu1 %v75_v18 }
  0x2d   :  { %168 = vmatmul.f32.gmra.mxu2 %v84_v15 }
  0x2e   :  { %209 = vmatmul.f32.gmra.mxu3 %v85_v20  ;;  %247 = vmatmul.f32.gmra.mxu0 %v423_v9 }
  0x30   :  { %281 = vmatmul.f32.gmra.mxu1 %v423_v9 }
  0x35   :  { %173 = vmatmul.f32.gmra.mxu2 %v92_v17 }
  0x36   :  { %215 = vmatmul.f32.gmra.mxu3 %v93_v26  ;;  %251 = vmatmul.f32.gmra.mxu0 %v425_v10 }
  0x38   :  { %285 = vmatmul.f32.gmra.mxu1 %v425_v10 }
  0x61   :  { %v295_v4 = vpop.permute.xlu2 %294 }
  0x6a   :  { %v299_v23 = vpop.permute.xlu2 %298 }
  0x76   :  { %v20_v44 = vpop.permute.xlu0 %19  ;;  %v30_v53 = vpop.permute.xlu1 %29 }
  0x7e   :  { %v25_v49 = vpop.permute.xlu0 %24  ;;  %v35_v2 = vpop.permute.xlu1 %34 }
  0x87   :  { %v303_v28 = vpop.permute.xlu0 %302 }
  0x89   :  { %v307_v35 = vpop.permute.xlu1 %306 }
  0x8b   :  { %v73_v38 = vpop.f32.mrf.mxu0 }
  0x8c   :  { %v74_v54 = vadd.f32 %v73_v38, %v20_v44 }
  0x8d   :  { %v123_v39 = vpop.f32.mrf.mxu1 }
  0x8e   :  { %v124_v59 = vadd.f32 %v123_v39, %v74_v54 }
  0x90   :  { %v89_v40 = vpop.f32.mrf.mxu2 }
  0x91   :  { %v131_v41 = vpop.f32.mrf.mxu3  ;;  %v90_v62 = vadd.f32 %v89_v40, %v30_v53 }
  0x93   :  { %v81_v42 = vpop.f32.mrf.mxu0  ;;  %v132_v1 = vadd.f32 %v131_v41, %v90_v62 }
  0x94   :  { %v82_v52 = vadd.f32 %v81_v42, %v25_v49 }
  0x95   :  { %v127_v43 = vpop.f32.mrf.mxu1 }
  0x96   :  { %v128_v56 = vadd.f32 %v127_v43, %v82_v52 }
  0x98   :  { %v97_v45 = vpop.f32.mrf.mxu2 }
  0x99   :  { %v135_v46 = vpop.f32.mrf.mxu3  ;;  %v98_v11 = vadd.f32 %v97_v45, %v35_v2 }
  0x9b   :  { %v240_v47 = vpop.f32.mrf.mxu0  ;;  %v136_v16 = vadd.f32 %v135_v46, %v98_v11  ;;  %v324_v46 = vpop.permute.xlu2 %323 }
  0x9d   :  { %v274_v48 = vpop.f32.mrf.mxu1 }
  0xa0   :  { %v159_v50 = vpop.f32.mrf.mxu2 }
  0xa1   :  { %v198_v51 = vpop.f32.mrf.mxu3  ;;  %v160_v63 = vadd.f32 %v159_v50, %v124_v59 }
  0xa3   :  { %v244_v55 = vpop.f32.mrf.mxu0  ;;  %v199_v3 = vadd.f32 %v198_v51, %v160_v63 }
  0xa5   :  { %v278_v58 = vpop.f32.mrf.mxu1  ;;  %v241_v12 = vadd.f32 %v240_v47, %v199_v3 }
  0xa7   :  { %v275_v17 = vadd.f32 %v274_v48, %v241_v12 }
  0xa8   :  { %v164_v57 = vpop.f32.mrf.mxu2 }
  0xa9   :  { %v165_v60 = vadd.f32 %v164_v57, %v128_v56  ;;  %v204_v61 = vpop.f32.mrf.mxu3  ;;  %v289_v25 = vmax.f32 %v275_v17, 0.0 }
  0xab   :  { %v205_v0 = vadd.f32 %v204_v61, %v165_v60  ;;  %v248_v6 = vpop.f32.mrf.mxu0  ;;  %v309_v32 = vmul.f32 %v295_v4, %v289_v25 }
  0xad   :  { %v245_v7 = vadd.f32 %v244_v55, %v205_v0  ;;  %v282_v10 = vpop.f32.mrf.mxu1 }
  0xaf   :  { %v279_v14 = vadd.f32 %v278_v58, %v245_v7 }
  0xb0   :  { %v169_v5 = vpop.f32.mrf.mxu2 }
  0xb1   :  { %v170_v8 = vadd.f32 %v169_v5, %v132_v1  ;;  %v210_v9 = vpop.f32.mrf.mxu3  ;;  %v290_v20 = vmax.f32 %v279_v14, 0.0 }
  0xb3   :  { %v211_v13 = vadd.f32 %v210_v9, %v170_v8  ;;  %v252_v24 = vpop.f32.mrf.mxu0  ;;  %v310_v30 = vmul.f32 %v299_v23, %v290_v20 }
  0xb5   :  { %v249_v15 = vadd.f32 %v248_v6, %v211_v13  ;;  %v286_v29 = vpop.f32.mrf.mxu1  ;;  %v313_v36 = vadd.f32 %v310_v30, %v309_v32 }
  0xb7   :  { %v283_v18 = vadd.f32 %v282_v10, %v249_v15 }
  0xb8   :  { %v174_v19 = vpop.f32.mrf.mxu2 }
  0xb9   :  { %v175_v21 = vadd.f32 %v174_v19, %v136_v16  ;;  %v216_v22 = vpop.f32.mrf.mxu3  ;;  %v291_v26 = vmax.f32 %v283_v18, 0.0 }
  0xbb   :  { %v217_v27 = vadd.f32 %v216_v22, %v175_v21  ;;  %v311_v33 = vmul.f32 %v303_v28, %v291_v26 }
  0xbd   :  { %v253_v31 = vadd.f32 %v252_v24, %v217_v27  ;;  %v314_v38 = vadd.f32 %v313_v36, %v311_v33 }
  0xbf   :  { %v287_v34 = vadd.f32 %v286_v29, %v253_v31 }
  0xc1   :  { %v292_v37 = vmax.f32 %v287_v34, 0.0 }
  0xc3   :  { %v312_v39 = vmul.f32 %v307_v35, %v292_v37 }
  0xc5   :  { %v315_v40 = vadd.f32 %v314_v38, %v312_v39 }
  0xc7   :  { %v316_v41 = vrot.slane %v315_v40, 4 }
  0xc9   :  { %v317_v42 = vadd.f32 %v316_v41, %v315_v40 }
  0xcb   :  { %v318_v43 = vrot.slane %v317_v42, 2 }
  0xcd   :  { %v319_v44 = vadd.f32 %v318_v43, %v317_v42 }
  0xcf   :  { %v320_v45 = vrot.slane %v319_v44, 1 }
  0xd1   :  { %v321_v47 = vadd.f32 %v320_v45, %v319_v44 }
  0xd3   :  { %v326_v48 = vadd.f32 %v324_v46, %v321_v47 }
  0xd5   :  { %327 = vst [vmem:[#allocation2] sm:$0x1] %v326_v48 }
  0xd6   :  { %338 = dma.vmem_to_hbm [thread:$0]  %s334_s18, 16, %s336_s21, [#allocation3]  }
  0xd7   :  { %381 = dma.done.wait [#allocation3], 16  }
  0xd8   :  { %382 = vsyncadd [#allocation3], 4294967280 }
  0xd9   :  { %343 = vsyncpa [#allocation3], 1 }

</bundles_post_ra>
